<compile_context>
chip_gen: v7x
topology: tpu7x:2x2x1
jax: 0.10.0
libtpu: 0.0.40
codegen_flags: <defaults>
</compile_context>

<pallas_src>
import jax
import jax.numpy as jnp
from jax.experimental import pallas as pl
from jax.experimental.pallas import tpu as pltpu


def _round_up(n: int, m: int) -> int:
    return ((n + m - 1) // m) * m


def dueling_q_kernel(x_ref, w1_ref, b1_ref, wh_ref, bh_ref,
                     wv2_ref, wa2_ref, qb_ref, q_ref):
    """One batch tile of the dueling-Q forward pass."""
    # feature = ReLU(x @ W1 + b1)   (MXU, f32 accumulation; elementwise in f32)
    feat = jnp.dot(x_ref[...], w1_ref[...], preferred_element_type=jnp.float32)
    feat = jnp.maximum(feat + b1_ref[...], 0.0)

    # Fused value/advantage hidden layer: one [B,H] @ [H,2H] matmul (wh=[wv1|wa1]).
    h = jnp.dot(feat.astype(wh_ref.dtype), wh_ref[...],
                preferred_element_type=jnp.float32)
    h = jnp.maximum(h + bh_ref[...], 0.0)                     # [B, 2H] = [vh | ah]

    # Value head (output width 1): VPU multiply + XLU lane reduce instead of an
    # MXU matmul with a 1-lane result. wv2 is zero-padded to [1, 2H] so the ah
    # half contributes nothing and we never slice h at a lane offset.
    value = jnp.sum(h * wv2_ref[...], axis=1, keepdims=True)  # [B, 1]

    # Advantage head: wa2 zero-padded to [2H, A] (top H rows zero) -> no slice.
    # Biases (ba2, bv2) were folded into qb host-side.
    adv = jnp.dot(h.astype(wa2_ref.dtype), wa2_ref[...],
                  preferred_element_type=jnp.float32)         # [B, A]
    adv_mean = jnp.mean(adv, axis=1, keepdims=True)

    # q = value + (adv - mean(adv))  (+ folded constant biases)
    q_ref[...] = (value + (adv - adv_mean) + qb_ref[...]).astype(q_ref.dtype)


def dueling_q_forward(x, params, *, block_b=128, param_dtype=jnp.bfloat16):
    """Full dueling-Q forward pass, batch-tiled over a 1-D Pallas grid."""
    (w1, b1, wv1, bv1, wv2, bv2, wa1, ba1, wa2, ba2) = params
    B, S = x.shape
    H = w1.shape[1]
    A = wa2.shape[1]
    f32 = jnp.float32

    # ---- host-side weight packing / constant folding (pure layout work) ----
    w1_p = w1.astype(param_dtype)
    b1_p = b1.astype(f32)
    wh_p = jnp.concatenate([wv1, wa1], axis=1).astype(param_dtype)      # [H, 2H]
    bh_p = jnp.concatenate([bv1, ba1], axis=1).astype(f32)              # [1, 2H]
    wv2_pad = jnp.concatenate(
        [wv2.reshape(1, H), jnp.zeros((1, H), f32)], axis=1).astype(f32)  # [1, 2H]
    wa2_pad = jnp.concatenate(
        [jnp.zeros((H, A), wa2.dtype), wa2], axis=0).astype(param_dtype)  # [2H, A]
    # q = value + (adv - mean(adv)): fold bv2 and (ba2 - mean(ba2)) into one bias.
    q_bias = (bv2 + ba2 - jnp.mean(ba2)).astype(f32)                    # [1, A]

    # ---- batch tiling: tile is a multiple of 8 sublanes; pad B up to it ----
    bb = min(block_b, _round_up(B, 8))
    bb = max(8, _round_up(bb, 8))
    B_pad = _round_up(B, bb)
    if B_pad != B:
        x = jnp.pad(x, ((0, B_pad - B), (0, 0)))
    x_p = x.astype(param_dtype)

    def resident(arr):
        # Same block index on every grid step -> fetched once, stays in VMEM.
        return pl.BlockSpec(arr.shape, lambda i: (0,) * arr.ndim)

    q_pad = pl.pallas_call(
        dueling_q_kernel,
        out_shape=jax.ShapeDtypeStruct((B_pad, A), f32),
        grid=(B_pad // bb,),
        in_specs=[
            pl.BlockSpec((bb, S), lambda i: (i, 0)),   # x: tiled along batch
            resident(w1_p), resident(b1_p),
            resident(wh_p), resident(bh_p),
            resident(wv2_pad), resident(wa2_pad), resident(q_bias),
        ],
        out_specs=pl.BlockSpec((bb, A), lambda i: (i, 0)),
        compiler_params=pltpu.CompilerParams(
            # Batch axis is embarrassingly parallel -> sharded across the two
            # TensorCores on v7x; a no-op on single-TC v5e/v6e.
            dimension_semantics=("parallel",)),
    )(x_p, w1_p, b1_p, wh_p, bh_p, wv2_pad, wa2_pad, q_bias)

    return q_pad[:B]


def init_params(key, state_dim, action_dim, hidden_dim):
    """Deterministic synthetic parameters in kernel-friendly [in, out] layout."""
    ks = jax.random.split(key, 10)

    def lin(kw, fan_in, fan_out):
        scale = 1.0 / jnp.sqrt(fan_in)
        return jax.random.uniform(kw, (fan_in, fan_out), jnp.float32, -scale, scale)

    w1  = lin(ks[0], state_dim,  hidden_dim)
    b1  = jax.random.uniform(ks[1], (1, hidden_dim), jnp.float32, -0.1, 0.1)
    wv1 = lin(ks[2], hidden_dim, hidden_dim)
    bv1 = jax.random.uniform(ks[3], (1, hidden_dim), jnp.float32, -0.1, 0.1)
    wv2 = lin(ks[4], hidden_dim, 1)
    bv2 = jax.random.uniform(ks[5], (1, 1), jnp.float32, -0.1, 0.1)
    wa1 = lin(ks[6], hidden_dim, hidden_dim)
    ba1 = jax.random.uniform(ks[7], (1, hidden_dim), jnp.float32, -0.1, 0.1)
    wa2 = lin(ks[8], hidden_dim, action_dim)
    ba2 = jax.random.uniform(ks[9], (1, action_dim), jnp.float32, -0.1, 0.1)
    return (w1, b1, wv1, bv1, wv2, bv2, wa1, ba1, wa2, ba2)


def reference_forward(x, params, param_dtype=jnp.float32):
    """Pure-JAX reference matching the PyTorch forward (and the kernel's casts)."""
    (w1, b1, wv1, bv1, wv2, bv2, wa1, ba1, wa2, ba2) = params
    hi = jax.lax.Precision.HIGHEST
    c = lambda a: a.astype(param_dtype).astype(jnp.float32)
    xq = c(x)
    feat = jax.nn.relu(jnp.dot(xq, c(w1), precision=hi) + b1)
    featq = c(feat)
    vh = jax.nn.relu(jnp.dot(featq, c(wv1), precision=hi) + bv1)
    ah = jax.nn.relu(jnp.dot(featq, c(wa1), precision=hi) + ba1)
    value = jnp.dot(vh, wv2, precision=hi) + bv2
    adv = jnp.dot(c(ah), c(wa2), precision=hi) + ba2
    return value + (adv - adv.mean(axis=1, keepdims=True))


if __name__ == "__main__":
    key = jax.random.PRNGKey(0)
    k_x, k_p, k_x2, k_p2 = jax.random.split(key, 4)

    # --- test 1: small shapes, f32 path, single batch tile -------------------
    B, S, A, H = 8, 16, 4, 32
    x = jax.random.normal(k_x, (B, S), jnp.float32)
    params = init_params(k_p, S, A, H)

    q = jax.block_until_ready(dueling_q_forward(x, params, param_dtype=jnp.float32))
    q_ref = reference_forward(x, params, param_dtype=jnp.float32)
    assert q.shape == (B, A)
    assert jnp.allclose(q, q_ref, atol=1e-2, rtol=1e-2), "f32 mismatch vs reference"

    # --- test 2: batch-tiled grid, bf16 weights with f32 accumulation --------
    B2, S2, A2, H2 = 256, 16, 8, 256   # module default hidden_dim=256
    x2 = jax.random.normal(k_x2, (B2, S2), jnp.float32)
    params2 = init_params(k_p2, S2, A2, H2)

    q2 = jax.block_until_ready(
        dueling_q_forward(x2, params2, block_b=128, param_dtype=jnp.bfloat16))
    q2_ref = reference_forward(x2, params2, param_dtype=jnp.bfloat16)
    assert q2.shape == (B2, A2)
    assert jnp.allclose(q2, q2_ref, atol=2e-2, rtol=2e-2), "bf16 mismatch vs reference"

    print("KERNEL_OK")
</pallas_src>

<mosaic_0001>
module attributes {stable_mosaic.version = 11 : i64} {
  func.func @dueling_q_kernel(%arg0: i32, %arg1: memref<8x16xf32, #tpu.memory_space<vmem>>, %arg2: memref<16x32xf32, #tpu.memory_space<vmem>>, %arg3: memref<1x32xf32, #tpu.memory_space<vmem>>, %arg4: memref<32x64xf32, #tpu.memory_space<vmem>>, %arg5: memref<1x64xf32, #tpu.memory_space<vmem>>, %arg6: memref<1x64xf32, #tpu.memory_space<vmem>>, %arg7: memref<64x4xf32, #tpu.memory_space<vmem>>, %arg8: memref<1x4xf32, #tpu.memory_space<vmem>>, %arg9: memref<8x4xf32, #tpu.memory_space<vmem>>) attributes {dimension_semantics = [#tpu.dimension_semantics<parallel>], iteration_bounds = array<i64: 1>, scalar_prefetch = 0 : i64, scratch_operands = 0 : i64, tpu.core_type = #tpu.core_type<tc>, window_params = [{transform_indices = @transform_0, window_bounds = array<i64: 8, 16>}, {pipeline_mode = #tpu.pipeline_mode<synchronous>, transform_indices = @transform_1, window_bounds = array<i64: 16, 32>}, {pipeline_mode = #tpu.pipeline_mode<synchronous>, transform_indices = @transform_2, window_bounds = array<i64: 1, 32>}, {pipeline_mode = #tpu.pipeline_mode<synchronous>, transform_indices = @transform_3, window_bounds = array<i64: 32, 64>}, {pipeline_mode = #tpu.pipeline_mode<synchronous>, transform_indices = @transform_4, window_bounds = array<i64: 1, 64>}, {pipeline_mode = #tpu.pipeline_mode<synchronous>, transform_indices = @transform_5, window_bounds = array<i64: 1, 64>}, {pipeline_mode = #tpu.pipeline_mode<synchronous>, transform_indices = @transform_6, window_bounds = array<i64: 64, 4>}, {pipeline_mode = #tpu.pipeline_mode<synchronous>, transform_indices = @transform_7, window_bounds = array<i64: 1, 4>}, {transform_indices = @transform_8, window_bounds = array<i64: 8, 4>}]} {
    %c0 = arith.constant 0 : index
    %c0_0 = arith.constant 0 : index
    %0 = vector.load %arg1[%c0, %c0_0] : memref<8x16xf32, #tpu.memory_space<vmem>>, vector<8x16xf32>
    %c0_1 = arith.constant 0 : index
    %c0_2 = arith.constant 0 : index
    %1 = vector.load %arg2[%c0_1, %c0_2] : memref<16x32xf32, #tpu.memory_space<vmem>>, vector<16x32xf32>
    %cst = arith.constant dense<0.000000e+00> : vector<8x32xf32>
    %2 = tpu.matmul %0, %1, %cst {dimension_numbers = #tpu.dot_dimension_numbers<[1], [0], [0], [1], [0, 0, 1, 1], [], []>} : vector<8x16xf32>, vector<16x32xf32>, vector<8x32xf32> -> vector<8x32xf32>
    %c0_3 = arith.constant 0 : index
    %c0_4 = arith.constant 0 : index
    %3 = vector.load %arg3[%c0_3, %c0_4] : memref<1x32xf32, #tpu.memory_space<vmem>>, vector<1x32xf32>
    %4 = vector.broadcast %3 : vector<1x32xf32> to vector<8x32xf32>
    %5 = arith.addf %2, %4 : vector<8x32xf32>
    %cst_5 = arith.constant 0.000000e+00 : f32
    %6 = vector.broadcast %cst_5 : f32 to vector<8x32xf32>
    %7 = arith.maximumf %5, %6 : vector<8x32xf32>
    %c0_6 = arith.constant 0 : index
    %c0_7 = arith.constant 0 : index
    %8 = vector.load %arg4[%c0_6, %c0_7] : memref<32x64xf32, #tpu.memory_space<vmem>>, vector<32x64xf32>
    %cst_8 = arith.constant dense<0.000000e+00> : vector<8x64xf32>
    %9 = tpu.matmul %7, %8, %cst_8 {dimension_numbers = #tpu.dot_dimension_numbers<[1], [0], [0], [1], [0, 0, 1, 1], [], []>} : vector<8x32xf32>, vector<32x64xf32>, vector<8x64xf32> -> vector<8x64xf32>
    %c0_9 = arith.constant 0 : index
    %c0_10 = arith.constant 0 : index
    %10 = vector.load %arg5[%c0_9, %c0_10] : memref<1x64xf32, #tpu.memory_space<vmem>>, vector<1x64xf32>
    %11 = vector.broadcast %10 : vector<1x64xf32> to vector<8x64xf32>
    %12 = arith.addf %9, %11 : vector<8x64xf32>
    %cst_11 = arith.constant 0.000000e+00 : f32
    %13 = vector.broadcast %cst_11 : f32 to vector<8x64xf32>
    %14 = arith.maximumf %12, %13 : vector<8x64xf32>
    %c0_12 = arith.constant 0 : index
    %c0_13 = arith.constant 0 : index
    %15 = vector.load %arg6[%c0_12, %c0_13] : memref<1x64xf32, #tpu.memory_space<vmem>>, vector<1x64xf32>
    %16 = vector.broadcast %15 : vector<1x64xf32> to vector<8x64xf32>
    %17 = arith.mulf %14, %16 : vector<8x64xf32>
    %cst_14 = arith.constant dense<0.000000e+00> : vector<8xf32>
    %18 = vector.multi_reduction <add>, %17, %cst_14 [1] : vector<8x64xf32> to vector<8xf32>
    %19 = vector.shape_cast %18 : vector<8xf32> to vector<8x1xf32>
    %c0_15 = arith.constant 0 : index
    %c0_16 = arith.constant 0 : index
    %20 = vector.load %arg7[%c0_15, %c0_16] : memref<64x4xf32, #tpu.memory_space<vmem>>, vector<64x4xf32>
    %cst_17 = arith.constant dense<0.000000e+00> : vector<8x4xf32>
    %21 = tpu.matmul %14, %20, %cst_17 {dimension_numbers = #tpu.dot_dimension_numbers<[1], [0], [0], [1], [0, 0, 1, 1], [], []>} : vector<8x64xf32>, vector<64x4xf32>, vector<8x4xf32> -> vector<8x4xf32>
    %cst_18 = arith.constant dense<0.000000e+00> : vector<8xf32>
    %22 = vector.multi_reduction <add>, %21, %cst_18 [1] : vector<8x4xf32> to vector<8xf32>
    %23 = vector.shape_cast %22 : vector<8xf32> to vector<8x1xf32>
    %cst_19 = arith.constant 4.000000e+00 : f32
    %24 = vector.broadcast %cst_19 : f32 to vector<8x1xf32>
    %25 = arith.divf %23, %24 : vector<8x1xf32>
    %26 = vector.broadcast %25 : vector<8x1xf32> to vector<8x4xf32>
    %27 = arith.subf %21, %26 : vector<8x4xf32>
    %28 = vector.broadcast %19 : vector<8x1xf32> to vector<8x4xf32>
    %29 = arith.addf %28, %27 : vector<8x4xf32>
    %c0_20 = arith.constant 0 : index
    %c0_21 = arith.constant 0 : index
    %30 = vector.load %arg8[%c0_20, %c0_21] : memref<1x4xf32, #tpu.memory_space<vmem>>, vector<1x4xf32>
    %31 = vector.broadcast %30 : vector<1x4xf32> to vector<8x4xf32>
    %32 = arith.addf %29, %31 : vector<8x4xf32>
    %c0_22 = arith.constant 0 : index
    %c0_23 = arith.constant 0 : index
    %33 = vector.load %arg9[%c0_22, %c0_23] : memref<8x4xf32, #tpu.memory_space<vmem>>, vector<8x4xf32>
    tpu.vector_store %arg9[%c0_22, %c0_23], %32 {strides = array<i32>} : memref<8x4xf32, #tpu.memory_space<vmem>>, vector<8x4xf32>,
    return
  }
  func.func @transform_0(%arg0: i32) -> (i32, i32) {
    %c0_i32 = arith.constant 0 : i32
    %c0_i32_0 = arith.constant 0 : i32
    return %arg0, %c0_i32 : i32, i32
  }
  func.func @transform_1(%arg0: i32) -> (i32, i32) {
    %c0_i32 = arith.constant 0 : i32
    %c0_i32_0 = arith.constant 0 : i32
    %c0_i32_1 = arith.constant 0 : i32
    return %c0_i32, %c0_i32_0 : i32, i32
  }
  func.func @transform_2(%arg0: i32) -> (i32, i32) {
    %c0_i32 = arith.constant 0 : i32
    %c0_i32_0 = arith.constant 0 : i32
    %c0_i32_1 = arith.constant 0 : i32
    return %c0_i32, %c0_i32_0 : i32, i32
  }
  func.func @transform_3(%arg0: i32) -> (i32, i32) {
    %c0_i32 = arith.constant 0 : i32
    %c0_i32_0 = arith.constant 0 : i32
    %c0_i32_1 = arith.constant 0 : i32
    return %c0_i32, %c0_i32_0 : i32, i32
  }
  func.func @transform_4(%arg0: i32) -> (i32, i32) {
    %c0_i32 = arith.constant 0 : i32
    %c0_i32_0 = arith.constant 0 : i32
    %c0_i32_1 = arith.constant 0 : i32
    return %c0_i32, %c0_i32_0 : i32, i32
  }
  func.func @transform_5(%arg0: i32) -> (i32, i32) {
    %c0_i32 = arith.constant 0 : i32
    %c0_i32_0 = arith.constant 0 : i32
    %c0_i32_1 = arith.constant 0 : i32
    return %c0_i32, %c0_i32_0 : i32, i32
  }
  func.func @transform_6(%arg0: i32) -> (i32, i32) {
    %c0_i32 = arith.constant 0 : i32
    %c0_i32_0 = arith.constant 0 : i32
    %c0_i32_1 = arith.constant 0 : i32
    return %c0_i32, %c0_i32_0 : i32, i32
  }
  func.func @transform_7(%arg0: i32) -> (i32, i32) {
    %c0_i32 = arith.constant 0 : i32
    %c0_i32_0 = arith.constant 0 : i32
    %c0_i32_1 = arith.constant 0 : i32
    return %c0_i32, %c0_i32_0 : i32, i32
  }
  func.func @transform_8(%arg0: i32) -> (i32, i32) {
    %c0_i32 = arith.constant 0 : i32
    %c0_i32_0 = arith.constant 0 : i32
    return %arg0, %c0_i32 : i32, i32
  }
}

</mosaic_0001>

<bundles_post_ra>
// kernel: tpu_custom_call.1
= control target key start
LH: loop header
LB: loop body
LE: loop exit
PB: predicated region body
PF: predicated region fallthrough
CT: control target
= control target key end

     0   :  { %v399_v0 = vmov 0.0|0.0   ;;  %vm400_vm0 = vmmov 0   ;;  %v401_v3 = vmov 0.0   ;;  %vm39_vm1 = vcmask 130048   ;;  %s510_s1 = inlined_call_operand.vmem [shape: f32[16,32], index: 1, kind: input, shape index: {}]   ;;  %s511_s3 = inlined_call_operand.vmem [shape: f32[32,64], index: 3, kind: input, shape index: {}]   ;;  %s512_s0 = inlined_call_operand.vmem [shape: f32[8,16], index: 0, kind: input, shape index: {}]   ;;  %s513_s6 = inlined_call_operand.vmem [shape: f32[64,4], index: 6, kind: input, shape index: {}]   ;;  %s514_s2 = inlined_call_operand.vmem [shape: f32[1,32], index: 2, kind: input, shape index: {}]   ;;  %s515_s4 = inlined_call_operand.vmem [shape: f32[1,64], index: 4, kind: input, shape index: {}]   ;;  %s516_s5 = inlined_call_operand.vmem [shape: f32[1,64], index: 5, kind: input, shape index: {}]   ;;  %s517_s7 = inlined_call_operand.vmem [shape: f32[1,4], index: 7, kind: input, shape index: {}]   ;;  %s518_s8 = inlined_call_operand.vmem [shape: f32[8,4], index: 8, kind: output, shape index: {}]  }
   0x1   :  { %375 = vmatprep.subr.bf16.mxu1 %v399_v0  ;;  %v30_v1 = vld [vmem:[%s510_s1] sm:$0xff]  ;;  %v31_v2 = vld [vmem:[%s510_s1 + $0x8] sm:$0xff]  ;;  %342 = vmatprep.mubr.msk.f32.mxu1 %vm400_vm0, %v401_v3  ;;  %v116_v9 = vld [vmem:[%s511_s3 + $0x10] sm:$0xff]  ;;  %vm125_vm2 = vcmask 261120   ;;  %vm208_vm3 = vcmask 523264   ;;  %vm293_vm4 = vcmask 31744  }
   0x2   :  { %v376_v4 = vpack.c.bf16 %v31_v2, %v30_v1  ;;  %v114_v5 = vld [vmem:[%s511_s3] sm:$0xff]  ;;  %v115_v6 = vld [vmem:[%s511_s3 + $0x8] sm:$0xff]  ;;  %384 = vmatprep.subr.bf16.mxu0 %v399_v0  ;;  %372 = vmatprep.mubr.msk.f32.mxu0 %vm400_vm0, %v401_v3  ;;  %v117_v10 = vld [vmem:[%s511_s3 + $0x18] sm:$0xff] }
   0x3   :  { %v29_v7 = vld [vmem:[%s512_s0] sm:$0xff]  ;;  %v379_v8 = vpack.c.bf16 %v115_v6, %v114_v5  ;;  %v382_v11 = vpack.c.bf16 %v117_v10, %v116_v9  ;;  %v213_v13 = vld [vmem:[%s513_s6 + $0x8] sm:$0xff]  ;;  %v214_v14 = vld [vmem:[%s513_s6 + $0x10] sm:$0xff] }
   0x4   :  { %377 = vmatpush3.bf16.msra.mxu1 %v376_v4  ;;  %v212_v12 = vld [vmem:[%s513_s6] sm:$0xff]  ;;  %v215_v16 = vld [vmem:[%s513_s6 + $0x18] sm:$0xff]  ;;  %v217_v19 = vld [vmem:[%s513_s6 + $0x28] sm:$0xff] }
   0x5   :  { %378 = vmatprep.subr.bf16.mxu1 %v399_v0  ;;  %v385_v15 = vpack.c.bf16 %v213_v13, %v212_v12  ;;  %v388_v17 = vpack.c.bf16 %v215_v16, %v214_v14  ;;  %v216_v18 = vld [vmem:[%s513_s6 + $0x20] sm:$0xff]  ;;  %v218_v26 = vld [vmem:[%s513_s6 + $0x30] sm:$0xff]  ;;  %v219_v27 = vld [vmem:[%s513_s6 + $0x38] sm:$0xff] }
   0x6   :  { %v391_v20 = vpack.c.bf16 %v217_v19, %v216_v18  ;;  %v314_v21 = vld [vmem:[%s514_s2] ss:$0 sm:$0xff]  ;;  %v394_v28 = vpack.c.bf16 %v219_v27, %v218_v26 }
   0x7   :  { %343 = vmatmul.mubr.msk.f32.vlgmr.msra.gmra.mrb[0].mxu1 %vm39_vm1, %v29_v7  ;;  %386 = vmatpush3.bf16.msra.mxu0 %v385_v15  ;;  %v316_v29 = vld [vmem:[%s515_s4] ss:$0 sm:$0xff] }
   0x8   :  { %380 = vmatpush3.bf16.msra.mxu1 %v379_v8  ;;  %353 = vmatprep.mubr.msk.f32.mxu1 %vm400_vm0, %v401_v3  ;;  %v318_v33 = vld [vmem:[%s516_s5] ss:$0 sm:$0xff] }
   0x9   :  { %381 = vmatprep.subr.bf16.mxu1 %v399_v0  ;;  %387 = vmatprep.subr.bf16.mxu0 %v399_v0  ;;  %v320_v43 = vld [vmem:[%s517_s7] ss:$0 sm:$0xff] }
   0xb   :  { %389 = vmatpush3.bf16.msra.mxu0 %v388_v17 }
   0xc   :  { %383 = vmatpush3.bf16.msra.mxu1 %v382_v11  ;;  %390 = vmatprep.subr.bf16.mxu0 %v399_v0 }
   0xf   :  { %392 = vmatpush3.bf16.msra.mxu0 %v391_v20 }
  0x10   :  { %393 = vmatprep.subr.bf16.mxu0 %v399_v0 }
  0x13   :  { %395 = vmatpush3.bf16.msra.mxu0 %v394_v28 }
  0xda   :  { %v109_v22 = vpop.f32.mrb[0].mxu1 }
  0xdb   :  { %v110_v23 = vadd.f32 %v314_v21, %v109_v22  ;;  %v344_v24 = vpop.f32.mrb[1].mxu1 }
  0xdd   :  { %v113_v25 = vmax.f32 %v110_v23, 0.0 }
  0xdf   :  { %354 = vmatmul.mubr.msk.f32.vlgmr.msra.gmra.mrb[2].mxu1 %vm125_vm2, %v113_v25 }
 0x1b2   :  { %v195_v30 = vpop.f32.mrb[2].mxu1 }
 0x1b3   :  { %v196_v31 = vadd.f32 %v316_v29, %v195_v30  ;;  %v355_v32 = vpop.f32.mrb[3].mxu1 }
 0x1b5   :  { %v199_v34 = vmax.f32 %v196_v31, 0.0 }
 0x1b7   :  { %373 = vmatmul.mubr.msk.f32.vlgmr.msra.gmra.mrb[0].mxu0 %vm208_vm3, %v199_v34  ;;  %v207_v35 = vmul.f32 %v318_v33, %v199_v34 }
 0x1b9   :  { %v209_v36 = vsel %vm208_vm3, %v207_v35, 0.0 }
 0x28a   :  { %v289_v37 = vpop.f32.mrb[0].mxu0 }
 0x28b   :  { %v374_v38 = vpop.f32.mrb[1].mxu0  ;;  %v294_v39 = vsel %vm293_vm4, %v289_v37, 0.0 }
 0x28c   :  { %295 = vadd.xlane.f32.xlu0 %v294_v39 }
 0x290   :  { %210 = vadd.xlane.f32.xlu0 %v209_v36 }
 0x319   :  { %v296_v40 = vpop.xlane.xlu0 %295 }
 0x31a   :  { %v298_v41 = vmul.f32 0.25, %v296_v40 }
 0x31c   :  { %v299_v42 = vsub.f32 %v289_v37, %v298_v41 }
 0x31d   :  { %v211_v44 = vpop.xlane.xlu0 %210 }
 0x31e   :  { %v300_v45 = vadd.f32 %v299_v42, %v211_v44 }
 0x320   :  { %v308_v46 = vadd.f32 %v320_v43, %v300_v45 }
 0x322   :  { %309 = vst.msk [vmem:[%s518_s8] sm:$0xff] %vm293_vm4, %v308_v46 }

</bundles_post_ra>
